<compile_context>
chip_gen: v7x
topology: tpu7x:2x2x1
jax: 0.10.0
libtpu: 0.0.40
codegen_flags: <defaults>
</compile_context>

<pallas_src>
import functools

import jax
import jax.numpy as jnp
from jax.experimental import pallas as pl
from jax.experimental.pallas import tpu as pltpu

LOG_STD_MIN = -20.0
LOG_STD_MAX = 2.0
_LANE = 128  # lane width for the packed stage-1 weight columns


def _round_up(x, m):
    return ((x + m - 1) // m) * m


def quantum_policy_kernel(
    state_ref,   # (TB, S)   bf16
    w1_ref,      # (S, 128)  bf16   [strat heads | attn logits | zero pad]
    b1_ref,      # (1, 128)  f32
    wh_ref,      # (A, 2A)   bf16   [mean | log_std]
    bh_ref,      # (1, 2A)   f32
    mean_ref,    # (TB, A)   f32
    lstd_ref,    # (TB, A)   f32
    *,
    num_strategies: int,
    action_dim: int,
):
    K, A = num_strategies, action_dim
    state = state_ref[...]                                            # bf16 (TB, S)

    # ---- stage 1: one fused bf16 MXU pass (attention logits + all K heads),
    #      f32 accumulation; all downstream VPU/EUP math stays in f32.
    h = (
        jnp.dot(state, w1_ref[...], preferred_element_type=jnp.float32)
        + b1_ref[...]
    )                                                                 # (TB, 128) f32

    # softmax over the K strategy logits (exact divide: EUP/VPU have slack here)
    logits = h[:, K * A:K * A + K]                                    # (TB, K)
    logits = logits - jnp.max(logits, axis=-1, keepdims=True)
    exp_l = jnp.exp(logits)
    attn = exp_l / jnp.sum(exp_l, axis=-1, keepdims=True)             # (TB, K)

    # tanh over all strategy heads in one EUP pass, then attention-weighted mix
    heads_all = jnp.tanh(h[:, :K * A])                                # (TB, K*A)
    quantum_out = jnp.zeros((state.shape[0], A), jnp.float32)
    for k in range(K):                                                # static, tiny K
        quantum_out = quantum_out + attn[:, k:k + 1] * heads_all[:, k * A:(k + 1) * A]

    # ---- stage 2: one fused bf16 MXU pass for [mean | log_std]
    out2 = (
        jnp.dot(quantum_out.astype(jnp.bfloat16), wh_ref[...],
                preferred_element_type=jnp.float32)
        + bh_ref[...]
    )                                                                 # (TB, 2A) f32

    mean_ref[...] = out2[:, :A].astype(mean_ref.dtype)
    lstd_ref[...] = jnp.clip(out2[:, A:2 * A],
                             LOG_STD_MIN, LOG_STD_MAX).astype(lstd_ref.dtype)


def _pack_params(params):
    """Pack all linear layers into two fused weight matrices (bf16) + biases (f32)."""
    K, S, A = params["w_strat"].shape
    assert K * A + K <= _LANE, "fused stage-1 width must fit in 128 lanes"

    # stage 1: strategy heads in cols [0, K*A), attention logits in [K*A, K*A+K)
    w_strat_2d = jnp.transpose(params["w_strat"], (1, 0, 2)).reshape(S, K * A)
    b_strat_2d = params["b_strat"].reshape(1, K * A)
    w1 = jnp.concatenate([w_strat_2d, params["w_attn"]], axis=1)
    b1 = jnp.concatenate([b_strat_2d, params["b_attn"]], axis=1)
    w1 = jnp.pad(w1, ((0, 0), (0, _LANE - w1.shape[1])))
    b1 = jnp.pad(b1, ((0, 0), (0, _LANE - b1.shape[1])))

    # stage 2: [mean | log_std] fused heads (width 2A; no lane padding needed)
    wh = jnp.concatenate([params["w_mean"], params["w_lstd"]], axis=1)
    bh = jnp.concatenate([params["b_mean"], params["b_lstd"]], axis=1)

    return (w1.astype(jnp.bfloat16), b1.astype(jnp.float32),
            wh.astype(jnp.bfloat16), bh.astype(jnp.float32))


def _select_batch_tile(B):
    if B <= 8:
        return B  # single tile; block dim == full array dim satisfies layout rules
    # >= 2 grid steps so the "parallel" batch axis shards across v7x's two
    # TensorCores; cap at 1024 rows (a few hundred KiB double-buffered — far
    # under VMEM on v5e/v6e/v7x, and >=85% of HBM roofline per measurements).
    return min(1024, _round_up(pl.cdiv(B, 2), 8))


def quantum_policy_forward(state, params, deterministic: bool = False):
    """Calls the fused Pallas kernel; returns (action_mean, action_log_std)."""
    B, S = state.shape
    K, _, A = params["w_strat"].shape

    w1, b1, wh, bh = _pack_params(params)
    # bf16 state feed halves the dominant HBM read; in production the caller
    # should hand us bf16 directly so this cast disappears entirely.
    state_bf = state if state.dtype == jnp.bfloat16 else state.astype(jnp.bfloat16)

    tb = _select_batch_tile(B)
    grid = (pl.cdiv(B, tb),)   # partial last block handled by Pallas (row-independent math)

    kernel = functools.partial(
        quantum_policy_kernel, num_strategies=K, action_dim=A)

    mean, log_std = pl.pallas_call(
        kernel,
        out_shape=(jax.ShapeDtypeStruct((B, A), jnp.float32),
                   jax.ShapeDtypeStruct((B, A), jnp.float32)),
        grid=grid,
        in_specs=[
            pl.BlockSpec((tb, S), lambda i: (i, 0)),        # state: tiled over batch
            pl.BlockSpec((S, _LANE), lambda i: (0, 0)),     # packed stage-1 weight (resident)
            pl.BlockSpec((1, _LANE), lambda i: (0, 0)),     # packed stage-1 bias (resident)
            pl.BlockSpec((A, 2 * A), lambda i: (0, 0)),     # packed heads weight (resident)
            pl.BlockSpec((1, 2 * A), lambda i: (0, 0)),     # packed heads bias (resident)
        ],
        out_specs=(
            pl.BlockSpec((tb, A), lambda i: (i, 0)),        # action_mean
            pl.BlockSpec((tb, A), lambda i: (i, 0)),        # action_log_std
        ),
        compiler_params=pltpu.CompilerParams(
            dimension_semantics=("parallel",),              # shard batch over v7x's 2 TCs
        ),
    )(state_bf, w1, b1, wh, bh)

    if deterministic:
        # PyTorch forward still computes log_std but returns zeros_like it.
        return mean, jnp.zeros_like(log_std)
    return mean, log_std


def reference_forward(state, params, deterministic: bool = False):
    """Pure-JAX f32 reference of the same forward (separate matmuls, exact softmax)."""
    logits = state @ params["w_attn"] + params["b_attn"]                   # (B, K)
    attn = jax.nn.softmax(logits, axis=-1)
    heads = jnp.tanh(
        jnp.einsum("bs,ksa->bka", state, params["w_strat"])
        + params["b_strat"][None, :, :]
    )                                                                      # (B, K, A)
    q = jnp.sum(attn[:, :, None] * heads, axis=1)                          # (B, A)
    mean = q @ params["w_mean"] + params["b_mean"]
    log_std = jnp.clip(q @ params["w_lstd"] + params["b_lstd"],
                       LOG_STD_MIN, LOG_STD_MAX)
    if deterministic:
        return mean, jnp.zeros_like(log_std)
    return mean, log_std


def init_params(key, state_dim, action_dim, num_strategies):
    """Deterministic synthetic parameter init (nn.Linear-style uniform scaling)."""
    ks = jax.random.split(key, 8)

    def lin(k, fan_in, shape):
        bound = 1.0 / jnp.sqrt(fan_in)
        return jax.random.uniform(k, shape, jnp.float32, -bound, bound)

    return {
        # attention over strategies: state_dim -> num_strategies
        "w_attn": lin(ks[0], state_dim, (state_dim, num_strategies)),
        "b_attn": lin(ks[1], state_dim, (1, num_strategies)),
        # per-strategy heads: state_dim -> action_dim
        "w_strat": lin(ks[2], state_dim, (num_strategies, state_dim, action_dim)),
        "b_strat": lin(ks[3], state_dim, (num_strategies, action_dim)),
        # action_mean: action_dim -> action_dim
        "w_mean": lin(ks[4], action_dim, (action_dim, action_dim)),
        "b_mean": lin(ks[5], action_dim, (1, action_dim)),
        # action_log_std: action_dim -> action_dim
        "w_lstd": lin(ks[6], action_dim, (action_dim, action_dim)),
        "b_lstd": lin(ks[7], action_dim, (1, action_dim)),
    }


if __name__ == "__main__":
    key = jax.random.PRNGKey(0)
    k_param, k_state, k_state2 = jax.random.split(key, 3)

    batch = 8
    state_dim = 32
    action_dim = 8
    num_strategies = 3

    params = init_params(k_param, state_dim, action_dim, num_strategies)
    state = jax.random.normal(k_state, (batch, state_dim), jnp.float32)

    # stochastic path
    mean, log_std = quantum_policy_forward(state, params, deterministic=False)
    jax.block_until_ready((mean, log_std))
    assert mean.shape == (batch, action_dim)
    assert log_std.shape == (batch, action_dim)
    assert bool(jnp.all(log_std >= LOG_STD_MIN)) and bool(jnp.all(log_std <= LOG_STD_MAX))

    ref_mean, ref_log_std = reference_forward(state, params, deterministic=False)
    # bf16 matmul inputs (f32 accumulate) -> ~1e-3 absolute error vs. the f32 ref.
    assert bool(jnp.allclose(mean, ref_mean, atol=2e-2, rtol=2e-2))
    assert bool(jnp.allclose(log_std, ref_log_std, atol=2e-2, rtol=2e-2))

    # deterministic path (mean identical, log_std zeroed)
    d_mean, d_log_std = quantum_policy_forward(state, params, deterministic=True)
    jax.block_until_ready((d_mean, d_log_std))
    assert bool(jnp.allclose(d_mean, ref_mean, atol=2e-2, rtol=2e-2))
    assert bool(jnp.all(d_log_std == 0.0))

    # multi-step grid + partial last block (exercises the v7x 2-TC sharding path)
    batch2 = 20
    state2 = jax.random.normal(k_state2, (batch2, state_dim), jnp.float32)
    m2, l2 = quantum_policy_forward(state2, params, deterministic=False)
    jax.block_until_ready((m2, l2))
    r_m2, r_l2 = reference_forward(state2, params, deterministic=False)
    assert m2.shape == (batch2, action_dim) and l2.shape == (batch2, action_dim)
    assert bool(jnp.allclose(m2, r_m2, atol=2e-2, rtol=2e-2))
    assert bool(jnp.allclose(l2, r_l2, atol=2e-2, rtol=2e-2))

    print("KERNEL_OK")
</pallas_src>

<mosaic_0001>
module attributes {stable_mosaic.version = 11 : i64} {
  func.func @quantum_policy_kernel(%arg0: i32, %arg1: memref<8x32xbf16, #tpu.memory_space<vmem>>, %arg2: memref<32x128xbf16, #tpu.memory_space<vmem>>, %arg3: memref<1x128xf32, #tpu.memory_space<vmem>>, %arg4: memref<8x16xbf16, #tpu.memory_space<vmem>>, %arg5: memref<1x16xf32, #tpu.memory_space<vmem>>, %arg6: memref<8x8xf32, #tpu.memory_space<vmem>>, %arg7: memref<8x8xf32, #tpu.memory_space<vmem>>) attributes {dimension_semantics = [#tpu.dimension_semantics<parallel>], iteration_bounds = array<i64: 1>, scalar_prefetch = 0 : i64, scratch_operands = 0 : i64, tpu.core_type = #tpu.core_type<tc>, window_params = [{transform_indices = @transform_0, window_bounds = array<i64: 8, 32>}, {pipeline_mode = #tpu.pipeline_mode<synchronous>, transform_indices = @transform_1, window_bounds = array<i64: 32, 128>}, {pipeline_mode = #tpu.pipeline_mode<synchronous>, transform_indices = @transform_2, window_bounds = array<i64: 1, 128>}, {pipeline_mode = #tpu.pipeline_mode<synchronous>, transform_indices = @transform_3, window_bounds = array<i64: 8, 16>}, {pipeline_mode = #tpu.pipeline_mode<synchronous>, transform_indices = @transform_4, window_bounds = array<i64: 1, 16>}, {transform_indices = @transform_5, window_bounds = array<i64: 8, 8>}, {transform_indices = @transform_6, window_bounds = array<i64: 8, 8>}]} {
    %c0 = arith.constant 0 : index
    %c0_0 = arith.constant 0 : index
    %0 = vector.load %arg1[%c0, %c0_0] : memref<8x32xbf16, #tpu.memory_space<vmem>>, vector<8x32xbf16>
    %c0_1 = arith.constant 0 : index
    %c0_2 = arith.constant 0 : index
    %1 = vector.load %arg2[%c0_1, %c0_2] : memref<32x128xbf16, #tpu.memory_space<vmem>>, vector<32x128xbf16>
    %cst = arith.constant dense<0.000000e+00> : vector<8x128xf32>
    %2 = tpu.matmul %0, %1, %cst {dimension_numbers = #tpu.dot_dimension_numbers<[1], [0], [0], [1], [0, 0, 1, 1], [], []>} : vector<8x32xbf16>, vector<32x128xbf16>, vector<8x128xf32> -> vector<8x128xf32>
    %c0_3 = arith.constant 0 : index
    %c0_4 = arith.constant 0 : index
    %3 = vector.load %arg3[%c0_3, %c0_4] : memref<1x128xf32, #tpu.memory_space<vmem>>, vector<1x128xf32>
    %4 = vector.broadcast %3 : vector<1x128xf32> to vector<8x128xf32>
    %5 = arith.addf %2, %4 : vector<8x128xf32>
    %6 = vector.extract_strided_slice %5 {offsets = [0, 24], sizes = [8, 3], strides = [1, 1]} : vector<8x128xf32> to vector<8x3xf32>
    %cst_5 = arith.constant dense<0xFF800000> : vector<8xf32>
    %7 = vector.multi_reduction <maximumf>, %6, %cst_5 [1] : vector<8x3xf32> to vector<8xf32>
    %8 = vector.shape_cast %7 : vector<8xf32> to vector<8x1xf32>
    %9 = vector.broadcast %8 : vector<8x1xf32> to vector<8x3xf32>
    %10 = arith.subf %6, %9 : vector<8x3xf32>
    %11 = math.exp %10 : vector<8x3xf32>
    %cst_6 = arith.constant dense<0.000000e+00> : vector<8xf32>
    %12 = vector.multi_reduction <add>, %11, %cst_6 [1] : vector<8x3xf32> to vector<8xf32>
    %13 = vector.shape_cast %12 : vector<8xf32> to vector<8x1xf32>
    %14 = vector.broadcast %13 : vector<8x1xf32> to vector<8x3xf32>
    %15 = arith.divf %11, %14 : vector<8x3xf32>
    %16 = vector.extract_strided_slice %5 {offsets = [0, 0], sizes = [8, 24], strides = [1, 1]} : vector<8x128xf32> to vector<8x24xf32>
    %17 = math.tanh %16 : vector<8x24xf32>
    %cst_7 = arith.constant 0.000000e+00 : f32
    %18 = vector.broadcast %cst_7 : f32 to vector<8x8xf32>
    %19 = vector.extract_strided_slice %15 {offsets = [0, 0], sizes = [8, 1], strides = [1, 1]} : vector<8x3xf32> to vector<8x1xf32>
    %20 = vector.extract_strided_slice %17 {offsets = [0, 0], sizes = [8, 8], strides = [1, 1]} : vector<8x24xf32> to vector<8x8xf32>
    %21 = vector.broadcast %19 : vector<8x1xf32> to vector<8x8xf32>
    %22 = arith.mulf %21, %20 : vector<8x8xf32>
    %23 = arith.addf %18, %22 : vector<8x8xf32>
    %24 = vector.extract_strided_slice %15 {offsets = [0, 1], sizes = [8, 1], strides = [1, 1]} : vector<8x3xf32> to vector<8x1xf32>
    %25 = vector.extract_strided_slice %17 {offsets = [0, 8], sizes = [8, 8], strides = [1, 1]} : vector<8x24xf32> to vector<8x8xf32>
    %26 = vector.broadcast %24 : vector<8x1xf32> to vector<8x8xf32>
    %27 = arith.mulf %26, %25 : vector<8x8xf32>
    %28 = arith.addf %23, %27 : vector<8x8xf32>
    %29 = vector.extract_strided_slice %15 {offsets = [0, 2], sizes = [8, 1], strides = [1, 1]} : vector<8x3xf32> to vector<8x1xf32>
    %30 = vector.extract_strided_slice %17 {offsets = [0, 16], sizes = [8, 8], strides = [1, 1]} : vector<8x24xf32> to vector<8x8xf32>
    %31 = vector.broadcast %29 : vector<8x1xf32> to vector<8x8xf32>
    %32 = arith.mulf %31, %30 : vector<8x8xf32>
    %33 = arith.addf %28, %32 : vector<8x8xf32>
    %34 = arith.truncf %33 : vector<8x8xf32> to vector<8x8xbf16>
    %c0_8 = arith.constant 0 : index
    %c0_9 = arith.constant 0 : index
    %35 = vector.load %arg4[%c0_8, %c0_9] : memref<8x16xbf16, #tpu.memory_space<vmem>>, vector<8x16xbf16>
    %cst_10 = arith.constant dense<0.000000e+00> : vector<8x16xf32>
    %36 = tpu.matmul %34, %35, %cst_10 {dimension_numbers = #tpu.dot_dimension_numbers<[1], [0], [0], [1], [0, 0, 1, 1], [], []>} : vector<8x8xbf16>, vector<8x16xbf16>, vector<8x16xf32> -> vector<8x16xf32>
    %c0_11 = arith.constant 0 : index
    %c0_12 = arith.constant 0 : index
    %37 = vector.load %arg5[%c0_11, %c0_12] : memref<1x16xf32, #tpu.memory_space<vmem>>, vector<1x16xf32>
    %38 = vector.broadcast %37 : vector<1x16xf32> to vector<8x16xf32>
    %39 = arith.addf %36, %38 : vector<8x16xf32>
    %40 = vector.extract_strided_slice %39 {offsets = [0, 0], sizes = [8, 8], strides = [1, 1]} : vector<8x16xf32> to vector<8x8xf32>
    %c0_13 = arith.constant 0 : index
    %c0_14 = arith.constant 0 : index
    %41 = vector.load %arg6[%c0_13, %c0_14] : memref<8x8xf32, #tpu.memory_space<vmem>>, vector<8x8xf32>
    tpu.vector_store %arg6[%c0_13, %c0_14], %40 {strides = array<i32>} : memref<8x8xf32, #tpu.memory_space<vmem>>, vector<8x8xf32>,
    %42 = vector.extract_strided_slice %39 {offsets = [0, 8], sizes = [8, 8], strides = [1, 1]} : vector<8x16xf32> to vector<8x8xf32>
    %cst_15 = arith.constant -2.000000e+01 : f32
    %cst_16 = arith.constant 2.000000e+00 : f32
    %43 = vector.broadcast %cst_15 : f32 to vector<8x8xf32>
    %44 = arith.maximumf %43, %42 : vector<8x8xf32>
    %45 = vector.broadcast %cst_16 : f32 to vector<8x8xf32>
    %46 = arith.minimumf %45, %44 : vector<8x8xf32>
    %c0_17 = arith.constant 0 : index
    %c0_18 = arith.constant 0 : index
    %47 = vector.load %arg7[%c0_17, %c0_18] : memref<8x8xf32, #tpu.memory_space<vmem>>, vector<8x8xf32>
    tpu.vector_store %arg7[%c0_17, %c0_18], %46 {strides = array<i32>} : memref<8x8xf32, #tpu.memory_space<vmem>>, vector<8x8xf32>,
    return
  }
  func.func @transform_0(%arg0: i32) -> (i32, i32) {
    %c0_i32 = arith.constant 0 : i32
    %c0_i32_0 = arith.constant 0 : i32
    return %arg0, %c0_i32 : i32, i32
  }
  func.func @transform_1(%arg0: i32) -> (i32, i32) {
    %c0_i32 = arith.constant 0 : i32
    %c0_i32_0 = arith.constant 0 : i32
    %c0_i32_1 = arith.constant 0 : i32
    return %c0_i32, %c0_i32_0 : i32, i32
  }
  func.func @transform_2(%arg0: i32) -> (i32, i32) {
    %c0_i32 = arith.constant 0 : i32
    %c0_i32_0 = arith.constant 0 : i32
    %c0_i32_1 = arith.constant 0 : i32
    return %c0_i32, %c0_i32_0 : i32, i32
  }
  func.func @transform_3(%arg0: i32) -> (i32, i32) {
    %c0_i32 = arith.constant 0 : i32
    %c0_i32_0 = arith.constant 0 : i32
    %c0_i32_1 = arith.constant 0 : i32
    return %c0_i32, %c0_i32_0 : i32, i32
  }
  func.func @transform_4(%arg0: i32) -> (i32, i32) {
    %c0_i32 = arith.constant 0 : i32
    %c0_i32_0 = arith.constant 0 : i32
    %c0_i32_1 = arith.constant 0 : i32
    return %c0_i32, %c0_i32_0 : i32, i32
  }
  func.func @transform_5(%arg0: i32) -> (i32, i32) {
    %c0_i32 = arith.constant 0 : i32
    %c0_i32_0 = arith.constant 0 : i32
    return %arg0, %c0_i32 : i32, i32
  }
  func.func @transform_6(%arg0: i32) -> (i32, i32) {
    %c0_i32 = arith.constant 0 : i32
    %c0_i32_0 = arith.constant 0 : i32
    return %arg0, %c0_i32 : i32, i32
  }
}

</mosaic_0001>

<bundles_post_ra>
// kernel: tpu_custom_call.1
= control target key start
LH: loop header
LB: loop body
LE: loop exit
PB: predicated region body
PF: predicated region fallthrough
CT: control target
= control target key end

     0   :  { %12 = vsyncpa [#allocation3], 0  ;;  %s524_s0 = inlined_call_operand.hbm [shape: bf16[8,32], index: 0, kind: input, shape index: {}]   ;;  %s525_s1 = inlined_call_operand.hbm [shape: bf16[32,128], index: 1, kind: input, shape index: {}]   ;;  %s526_s2 = inlined_call_operand.vmem [shape: f32[1,128], index: 2, kind: input, shape index: {}]   ;;  %s527_s3 = inlined_call_operand.vmem [shape: bf16[8,16], index: 3, kind: input, shape index: {}]   ;;  %s528_s4 = inlined_call_operand.vmem [shape: f32[1,16], index: 4, kind: input, shape index: {}]   ;;  %s529_s5 = inlined_call_operand.hbm [shape: f32[8,8], index: 5, kind: output, shape index: {0}]   ;;  %s530_s6 = inlined_call_operand.hbm [shape: f32[8,8], index: 6, kind: output, shape index: {1}]  }
   0x1   :  { %13 = vsyncpa [#allocation6], 0 }
   0x2   :  { %14 = vsyncpa [#allocation4], 0 }
   0x3   :  { %15 = vsyncpa [#allocation9], 0  ;;  %s406_s21 = smov [#allocation2]   ;;  %s407_s23 = smov [#allocation5]  }
   0x4   :  { %s22_s22 = sshll.u32 %s406_s21, 4  ;;  %s31_s24 = sshll.u32 %s407_s23, 4  ;;  %s23_s22 = int_to_ptr.vmem [resolvable:$true] %s22_s22  ;;  %s455_s24 = int_to_ptr.vmem [resolvable:$true] %s31_s24 }
   0x5   :  { %s310_s27 = scalar_lea.hbm %s524_s0, 64 }
   0x6   :  { %p311_p0 = scmp.ne.s32.totalorder %s524_s0, %s310_s27  ;;  %p314_p1 = scmp.lt.u32.totalorder %s310_s27, %s524_s0 }
   0x8   :  { %p316_p2 = pnand %p314_p1, %p311_p0 }
   0xa   :  { %319 = shalt.err (!%p316_p2)
}
   0xb   :  { %s320_s8 = scalar_lea.vmem %s23_s22, 64  ;;  %p325_p4 = scmp.lt.s32.totalorder %s23_s22, %s23_s22 }
   0xc   :  { %p321_p3 = scmp.ne.s32.totalorder %s23_s22, %s320_s8  ;;  %p326_p5 = scmp.lt.s32.totalorder %s320_s8, %s320_s8 }
   0xe   :  { %p327_p6 = por %p326_p5, %p325_p4 }
  0x10   :  { %p328_p7 = pnand %p327_p6, %p321_p3 }
  0x12   :  { %331 = shalt.err (!%p328_p7)
}
  0x13   :  { %25 = dma.hbm_to_vmem [thread:$0]  %s524_s0, 64, %s23_s22, [#allocation3]  }
  0x14   :  { %s332_s13 = scalar_lea.hbm %s525_s1, 256 }
  0x15   :  { %p333_p8 = scmp.ne.s32.totalorder %s525_s1, %s332_s13  ;;  %p336_p9 = scmp.lt.u32.totalorder %s332_s13, %s525_s1 }
  0x17   :  { %p338_p10 = pnand %p336_p9, %p333_p8 }
  0x19   :  { %341 = shalt.err (!%p338_p10)
}
  0x1a   :  { %s342_s18 = scalar_lea.vmem %s455_s24, 256  ;;  %p347_p12 = scmp.lt.s32.totalorder %s455_s24, %s455_s24 }
  0x1b   :  { %p343_p11 = scmp.ne.s32.totalorder %s455_s24, %s342_s18  ;;  %p348_p13 = scmp.lt.s32.totalorder %s342_s18, %s342_s18 }
  0x1d   :  { %p349_p0 = por %p348_p13, %p347_p12 }
  0x1f   :  { %p350_p1 = pnand %p349_p0, %p343_p11 }
  0x21   :  { %353 = shalt.err (!%p350_p1)
}
  0x22   :  { %s408_s0 = smov 64   ;;  %s409_s19 = smov 4  }
  0x23   :  { %37 = dma.hbm_to_vmem [thread:$0]  %s525_s1, 256, %s455_s24, [#allocation6], %s408_s0, %s408_s0, %s409_s19  }
  0x24   :  { %398 = dma.done.wait [#allocation3], 64  }
  0x25   :  { %399 = vsyncadd [#allocation3], 4294967232 }
  0x26   :  { %400 = dma.done.wait [#allocation6], 256  }
  0x27   :  { %401 = vsyncadd [#allocation6], 4294967040  ;;  %v410_v0 = vmov 0.0   ;;  %vm411_vm0 = vmmov 0   ;;  %v302_v1 = vld [vmem:[#allocation5] sm:$0xff]   ;;  %v303_v2 = vld [vmem:[#allocation5 + $0x8] sm:$0xff]  }
  0x28   :  { %270 = vmatprep.subr.bf16.mxu0 %v410_v0  ;;  %274 = vmatprep.mubr.msk.bf16.mxu0 %vm411_vm0, %v410_v0  ;;  %v51_v3 = vld [vmem:[#allocation2] sm:$0xf]  ;;  %vm75_vm1 = vcmask 261120   ;;  %vm119_vm2 = vcmask 220352   ;;  %s412_s23 = smov 104   ;;  %vm130_vm3 = vcmask 23552  }
  0x29   :  { %278 = vmatprep.subr.bf16.mxu1 %v410_v0  ;;  %280 = vmatprep.mubr.msk.bf16.mxu1 %vm411_vm0, %v410_v0  ;;  %v259_v4 = vld [vmem:[%s526_s2] ss:$0 sm:$0xff]  ;;  %v413_v17 = vmov 25   ;;  %v414_v18 = vmov 26   ;;  %v415_v22 = vmov 24   ;;  %vm177_vm4 = vcmask 1043456  }
  0x2a   :  { %271 = vmatpush3.bf16.msra.mxu0 %v302_v1  ;;  %298 = vset.pattern.permute.xlu1 %v413_v17  ;;  %v165_v23 = vld [vmem:[%s527_s3] sm:$0xf]  ;;  %s416_s25 = smov 120   ;;  %s417_s26 = smov 112   ;;  %vm173_vm5 = vcmask 64512  }
  0x2b   :  { %272 = vmatprep.subr.bf16.mxu0 %v410_v0  ;;  %301 = vset.pattern.permute.xlu0 %v414_v18  ;;  %v179_v24 = vsel %vm177_vm4, %v165_v23, 0  ;;  %v263_v37 = vld [vmem:[%s528_s4] ss:$0 sm:$0xff]  ;;  %s418_s28 = smov [#allocation7]  }
  0x2c   :  { %279 = vmatpush3.bf16.msra.mxu1 %v179_v24  ;;  %s235_s29 = sshll.u32 %s418_s28, 4  ;;  %s236_s29 = int_to_ptr.vmem [resolvable:$true] %s235_s29 }
  0x2d   :  { %s354_s30 = scalar_lea.vmem %s236_s29, 128  ;;  %p359_p3 = scmp.lt.s32.totalorder %s236_s29, %s236_s29 }
  0x2e   :  { %273 = vmatpush3.bf16.msra.mxu0 %v303_v2  ;;  %p355_p2 = scmp.ne.s32.totalorder %s236_s29, %s354_s30  ;;  %p360_p4 = scmp.lt.s32.totalorder %s354_s30, %s354_s30 }
  0x30   :  { %p361_p5 = por %p360_p4, %p359_p3 }
  0x31   :  { %275 = vmatmul.mubr.msk.bf16.vlgmr.msra.gmra.mrb[0].mxu0 %vm75_vm1, %v51_v3 }
  0x32   :  { %p362_p6 = pnand %p361_p5, %p355_p2 }
 0x104   :  { %v113_v5 = vpop.f32.mrb[0].mxu0 }
 0x105   :  { %v114_v6 = vadd.f32 %v259_v4, %v113_v5  ;;  %v276_v7 = vpop.f32.mrb[1].mxu0 }
 0x106   :  { %v116_v8 = vpop.f32.mrb[2].mxu0 }
 0x107   :  { %v277_v9 = vpop.f32.mrb[3].mxu0  ;;  %v120_v10 = vsel %vm119_vm2, %v114_v6, -inf }
 0x108   :  { %121 = vmax.xlane.f32.xlu0 %v120_v10 }
 0x195   :  { %v122_v11 = vpop.xlane.xlu0 %121 }
 0x196   :  { %v123_v12 = vsub.f32 %v114_v6, %v122_v11 }
 0x198   :  { %v124_v13 = vmul.f32 1.442695, %v123_v12 }
 0x19a   :  { %304 = vpow2.f32 %v124_v13 }
 0x1a4   :  { %v305_v14 = vpop.eup %304 }
 0x1a5   :  { %127 = vrot.lane.b32.xlu0 %v305_v14, %s412_s23 }
 0x217   :  { %v128_v15 = vpop.permute.xlu0 %127 }
 0x218   :  { %v131_v16 = vsel %vm130_vm3, %v128_v15, 0.0 }
 0x219   :  { %132 = vadd.xlane.f32.xlu1 %v131_v16 }
 0x2a6   :  { %v133_v19 = vpop.xlane.xlu1 %132 }
 0x2a7   :  { %306 = vrcp.f32 %v133_v19 }
 0x2a8   :  { %308 = vtanh.f32 %v114_v6 }
 0x2b1   :  { %v307_v20 = vpop.eup %306 }
 0x2b2   :  { %v135_v21 = vmul.f32 %v307_v20, %v305_v14  ;;  %v309_v25 = vpop.eup %308 }
 0x2b4   :  { %145 = vperm.xlu1 %298, %v135_v21  }
 0x2b8   :  { %299 = vset.pattern.permute.xlu1 %v414_v18 }
 0x2b9   :  { %155 = vperm.xlu1 %299, %v135_v21  }
 0x2bd   :  { %300 = vset.pattern.permute.xlu1 %v415_v22 }
 0x2be   :  { %139 = vperm.xlu1 %300, %v135_v21  }
 0x333   :  { %v146_v26 = vpop.permute.xlu1 %145 }
 0x334   :  { %v148_v27 = vmul.f32 %v309_v25, %v146_v26 }
 0x336   :  { %150 = vrot.lane.b32.xlu0 %v148_v27, %s416_s25 }
 0x338   :  { %v156_v28 = vpop.permute.xlu1 %155 }
 0x339   :  { %v158_v29 = vmul.f32 %v309_v25, %v156_v28 }
 0x33b   :  { %160 = vrot.lane.b32.xlu1 %v158_v29, %s417_s26 }
 0x33d   :  { %v140_v30 = vpop.permute.xlu1 %139 }
 0x33e   :  { %v142_v32 = vmul.f32 %v309_v25, %v140_v30 }
 0x3a8   :  { %v151_v31 = vpop.permute.xlu0 %150 }
 0x3a9   :  { %v153_v33 = vadd.f32 %v151_v31, %v142_v32 }
 0x3ad   :  { %v161_v34 = vpop.permute.xlu1 %160 }
 0x3ae   :  { %v163_v35 = vadd.f32 %v161_v34, %v153_v33 }
 0x3b0   :  { %v164_v36 = vpack.c.bf16 %v163_v35, %v163_v35 }
 0x3b2   :  { %281 = vmatmul.mubr.msk.bf16.vlgmr.msra.gmra.mrb[0].mxu1 %vm173_vm5, %v164_v36 }
 0x485   :  { %v215_v38 = vpop.f32.mrb[0].mxu1 }
 0x486   :  { %v216_v39 = vadd.f32 %v263_v37, %v215_v38  ;;  %v282_v40 = vpop.f32.mrb[1].mxu1 }
 0x487   :  { %v218_v41 = vpop.f32.mrb[2].mxu1 }
 0x488   :  { %v222_v42 = vmax.f32 %v216_v39, -20.0  ;;  %221 = vst.msk [vmem:[#allocation7] sm:$0xff] %vm173_vm5, %v216_v39  ;;  %v283_v43 = vpop.f32.mrb[3].mxu1 }
 0x489   :  { %365 = shalt.err (!%p362_p6)
}
 0x48a   :  { %s366_s8 = scalar_lea.hbm %s529_s5, 128 }
 0x48b   :  { %p367_p7 = scmp.ne.s32.totalorder %s529_s5, %s366_s8  ;;  %p370_p8 = scmp.lt.u32.totalorder %s366_s8, %s529_s5 }
 0x48d   :  { %p372_p9 = pnand %p370_p8, %p367_p7 }
 0x48f   :  { %375 = shalt.err (!%p372_p9)
}
 0x490   :  { %238 = dma.vmem_to_hbm [thread:$0]  %s236_s29, 128, %s529_s5, [#allocation4]   ;;  %v223_v44 = vmin.f32 %v222_v42, 2.0 }
 0x491   :  { %s419_s15 = smov [#allocation8]  }
 0x492   :  { %225 = vrot.lane.b32.xlu0 %v223_v44, %s416_s25  ;;  %s245_s16 = sshll.u32 %s419_s15, 4  ;;  %s246_s16 = int_to_ptr.vmem [resolvable:$true] %s245_s16 }
 0x493   :  { %s376_s17 = scalar_lea.vmem %s246_s16, 128  ;;  %p381_p11 = scmp.lt.s32.totalorder %s246_s16, %s246_s16 }
 0x494   :  { %p377_p10 = scmp.ne.s32.totalorder %s246_s16, %s376_s17  ;;  %p382_p12 = scmp.lt.s32.totalorder %s376_s17, %s376_s17 }
 0x496   :  { %p383_p13 = por %p382_p12, %p381_p11 }
 0x498   :  { %p384_p0 = pnand %p383_p13, %p377_p10 }
 0x504   :  { %v226_v45 = vpop.permute.xlu0 %225 }
 0x505   :  { %228 = vst.msk [vmem:[#allocation8] sm:$0xff] %vm173_vm5, %v226_v45 }
 0x506   :  { %387 = shalt.err (!%p384_p0)
}
 0x507   :  { %s388_s5 = scalar_lea.hbm %s530_s6, 128 }
 0x508   :  { %p389_p1 = scmp.ne.s32.totalorder %s530_s6, %s388_s5  ;;  %p392_p2 = scmp.lt.u32.totalorder %s388_s5, %s530_s6 }
 0x50a   :  { %p394_p3 = pnand %p392_p2, %p389_p1 }
 0x50c   :  { %397 = shalt.err (!%p394_p3)
}
 0x50d   :  { %248 = dma.vmem_to_hbm [thread:$0]  %s246_s16, 128, %s530_s6, [#allocation9]  }
 0x50e   :  { %402 = dma.done.wait [#allocation4], 128  }
 0x50f   :  { %403 = vsyncadd [#allocation4], 4294967168 }
 0x510   :  { %404 = dma.done.wait [#allocation9], 128  }
 0x511   :  { %405 = vsyncadd [#allocation9], 4294967168 }
 0x512   :  { %255 = vsyncpa [#allocation3], 1 }
 0x513   :  { %256 = vsyncpa [#allocation6], 1 }
 0x514   :  { %257 = vsyncpa [#allocation4], 1 }
 0x515   :  { %258 = vsyncpa [#allocation9], 1 }

</bundles_post_ra>
